<compile_context>
chip_gen: v5e
topology: v5e:2x2
jax: 0.10.0
libtpu: 0.0.40
codegen_flags: <defaults>
</compile_context>

<pallas_src>
import functools
import math

import jax
import jax.numpy as jnp
from jax import lax
from jax.experimental import pallas as pl
from jax.experimental.pallas import tpu as pltpu


def _label_smoothing_kernel(tgt_ref, logp_ref, out_ref, acc_ref, *,
                            confidence, smoothing, conf_logconf, smooth_logsmooth,
                            ignore_index, ignore_col, vocab, batch,
                            tile_b, tile_v, mask_rows, mask_cols, tgt_resident):
    i = pl.program_id(0)            # batch-tile index   ("parallel")
    j = pl.program_id(1)            # vocab-tile index   ("arbitrary" reduction)
    nj = pl.num_programs(1)

    # Log-probs stream in their native dtype; upcast in-register.
    logp = logp_ref[...].astype(jnp.float32)                        # (TB, TV)
    # Global column ids for this vocab tile.
    col = lax.broadcasted_iota(jnp.int32, logp.shape, 1) + j * tile_v

    # Target ids: resident copy sliced per batch tile (no per-step narrow DMA).
    if tgt_resident:
        row0 = pl.multiple_of(i * tile_b, tile_b)
        tgt = tgt_ref[pl.ds(row0, tile_b), :]                       # (TB, 1)
    else:
        tgt = tgt_ref[...]                                          # (TB, 1)

    if mask_cols:                   # ragged vocab tail: zero padding columns
        logp = jnp.where(col < vocab, logp, 0.0)

    # Smoothed distribution p(c):
    #   confidence  at c == tgt
    #   0           at c == ignore_col (unless tgt == ignore_col)
    #   smoothing   elsewhere
    # sum_c p*logp == smoothing*rowsum(logp) + sum_c delta(c)*logp  (no lane extract)
    delta = jnp.where(col == tgt, confidence - smoothing,
                      jnp.where(col == ignore_col, -smoothing, 0.0))
    partial = (smoothing * jnp.sum(logp, axis=-1, keepdims=True)
               + jnp.sum(delta * logp, axis=-1, keepdims=True))     # (TB, 1)

    @pl.when(j == 0)
    def _():
        acc_ref[...] = jnp.zeros_like(acc_ref)

    acc_ref[...] += partial

    @pl.when(j == nj - 1)
    def _():
        row_valid = tgt != ignore_index          # module zeroes these rows
        if mask_rows:                            # ragged batch tail
            row = lax.broadcasted_iota(jnp.int32, tgt.shape, 0) + i * tile_b
            row_valid = jnp.logical_and(row_valid, row < batch)
        # sum_c xlogy(p, p) depends only on whether the scatter hit ignore_col.
        n_smooth = jnp.where(tgt == ignore_col, float(vocab - 1), float(vocab - 2))
        p_log_p = conf_logconf + n_smooth * smooth_logsmooth
        contrib = jnp.where(row_valid, p_log_p - acc_ref[...], 0.0)  # (TB, 1)
        # One partial-loss block per batch tile (parallel axis -> no race).
        out_ref[...] = jnp.zeros(out_ref.shape, jnp.float32) + jnp.sum(contrib)


def _tpu_block_budget():
    """(target log-prob block bytes, vmem_limit cap) tuned per TPU generation."""
    kind = ""
    try:
        kind = jax.devices()[0].device_kind.lower()
    except Exception:
        pass
    if "v5 lite" in kind or "v5e" in kind or "v5lite" in kind:
        return 3 << 20, 64 << 20      # v5e: ~0.82 TB/s, 16 MiB scoped default gate
    if "v6" in kind:
        return 6 << 20, 64 << 20      # v6e: ~1.4 TB/s, 128 MiB physical VMEM
    if "v7" in kind or "7x" in kind:
        return 8 << 20, 32 << 20      # v7x: ~3.2 TB/s, 64 MiB physical VMEM / TC
    return 4 << 20, 32 << 20          # unknown: conservative


def _pick_tiles(batch, vocab, dtype, target_bytes):
    item = jnp.dtype(dtype).itemsize
    # Vocab (lane) tile: full rows if >=8 of them fit the budget, else a
    # 128-multiple chunk so huge vocabularies never blow VMEM / shrink tile_b.
    if vocab * item * 8 <= target_bytes:
        tile_v = vocab
    else:
        tile_v = max(128, (target_bytes // (8 * item)) // 128 * 128)
        if tile_v >= vocab:
            tile_v = vocab
    # Batch (sublane) tile: fill the budget, keep it a multiple of 8, and keep
    # >=2 batch tiles so both v7x TensorCores can stream the "parallel" axis.
    if batch <= 8:
        tile_b = batch
    else:
        ideal = max(8, (target_bytes // (tile_v * item)) // 8 * 8)
        tile_b = min(ideal, (batch + 7) // 8 * 8)
        half = max(8, ((batch + 1) // 2 + 7) // 8 * 8)
        tile_b = min(tile_b, half)
    return tile_b, tile_v


def label_smoothing_loss(output, target, *, label_smoothing, tgt_vocab_size,
                         ignore_index=-100, tile_b=None, tile_v=None):
    """output: (B, V) log-probs (any float dtype); target: (B,) int ids. Scalar loss."""
    B, V = output.shape
    assert V == tgt_vocab_size
    assert 0.0 < label_smoothing <= 1.0
    assert tgt_vocab_size > 2, "smoothing_value divides by (vocab - 2)"

    confidence = 1.0 - label_smoothing
    smoothing = label_smoothing / (tgt_vocab_size - 2)
    conf_logconf = confidence * math.log(confidence) if confidence > 0.0 else 0.0
    smooth_logsmooth = smoothing * math.log(smoothing)
    # torch negative indexing: one_hot[ignore_index] zeroes column V + ignore_index.
    # With a negative ignore_index no real target ever equals it, so no row is
    # masked — exactly the PyTorch module's behavior.
    ignore_col = ignore_index if ignore_index >= 0 else tgt_vocab_size + ignore_index

    target_bytes, vmem_cap = _tpu_block_budget()
    auto_b, auto_v = _pick_tiles(B, V, output.dtype, target_bytes)
    if tile_b is None:
        tile_b = auto_b
    if tile_v is None:
        tile_v = auto_v
    assert tile_b == B or tile_b % 8 == 0, "tile_b must be a multiple of 8 (or B)"
    assert tile_v == V or tile_v % 128 == 0, "tile_v must be a multiple of 128 (or V)"

    num_b = pl.cdiv(B, tile_b)
    num_v = pl.cdiv(V, tile_v)
    mask_rows = (B % tile_b) != 0
    mask_cols = (V % tile_v) != 0
    b_pad = num_b * tile_b

    tgt2d = target.astype(jnp.int32).reshape(B, 1)
    if b_pad != B:
        tgt2d = jnp.pad(tgt2d, ((0, b_pad - B), (0, 0)))   # padded rows are masked off

    # Make the (tiny) target vector resident unless B is huge.
    tgt_resident = (4 * b_pad) <= (1 << 21)
    if tgt_resident:
        tgt_spec = pl.BlockSpec((b_pad, 1), lambda i, j: (0, 0))
    else:
        tgt_spec = pl.BlockSpec((tile_b, 1), lambda i, j: (i, 0))

    kernel = functools.partial(
        _label_smoothing_kernel,
        confidence=float(confidence),
        smoothing=float(smoothing),
        conf_logconf=float(conf_logconf),
        smooth_logsmooth=float(smooth_logsmooth),
        ignore_index=int(ignore_index),
        ignore_col=int(ignore_col),
        vocab=int(tgt_vocab_size),
        batch=int(B),
        tile_b=int(tile_b),
        tile_v=int(tile_v),
        mask_rows=bool(mask_rows),
        mask_cols=bool(mask_cols),
        tgt_resident=bool(tgt_resident),
    )

    block_bytes = tile_b * tile_v * jnp.dtype(output.dtype).itemsize
    tgt_bytes = 4 * (b_pad if tgt_resident else tile_b)
    vmem_limit = int(2.75 * block_bytes) + 2 * tgt_bytes + (2 << 20)
    vmem_limit = int(max(16 << 20, min(vmem_limit, vmem_cap)))

    partials = pl.pallas_call(
        kernel,
        out_shape=jax.ShapeDtypeStruct((num_b, 8, 128), jnp.float32),
        grid=(num_b, num_v),
        in_specs=[
            tgt_spec,                                              # target ids
            pl.BlockSpec((tile_b, tile_v), lambda i, j: (i, j)),   # log-prob tile
        ],
        out_specs=pl.BlockSpec((1, 8, 128), lambda i, j: (i, 0, 0)),
        scratch_shapes=[pltpu.VMEM((tile_b, 1), jnp.float32)],     # per-row p.logp acc
        compiler_params=pltpu.CompilerParams(
            dimension_semantics=("parallel", "arbitrary"),
            vmem_limit_bytes=vmem_limit,
        ),
    )(tgt2d, output)

    return jnp.sum(partials[:, 0, 0])


def _reference(output, target, *, label_smoothing, tgt_vocab_size, ignore_index):
    """Pure-JAX mirror of the PyTorch forward, for correctness checking."""
    B = target.shape[0]
    out32 = output.astype(jnp.float32)
    confidence = 1.0 - label_smoothing
    smoothing = label_smoothing / (tgt_vocab_size - 2)
    one_hot = jnp.full((tgt_vocab_size,), smoothing, jnp.float32)
    one_hot = one_hot.at[ignore_index].set(0.0)
    p = jnp.tile(one_hot[None, :], (B, 1))
    p = p.at[jnp.arange(B), target].set(confidence)
    p = jnp.where((target == ignore_index)[:, None], 0.0, p)
    plogp = jnp.where(p > 0.0, p * jnp.log(p), 0.0)
    return jnp.sum(plogp - p * out32)


if __name__ == "__main__":
    key = jax.random.PRNGKey(0)
    k1, k2, k3, k4 = jax.random.split(key, 4)

    # Case 1: small shapes matching the module, nonnegative ignore_index,
    # auto-tiled (>=2 parallel batch tiles).
    B1, V1 = 16, 128
    LS1, IGN1 = 0.1, 0
    logits1 = jax.random.normal(k1, (B1, V1), dtype=jnp.float32)
    output1 = jax.nn.log_softmax(logits1, axis=-1)
    target1 = jax.random.randint(k2, (B1,), 1, V1, dtype=jnp.int32)
    target1 = target1.at[0].set(IGN1)                  # exercise the ignore mask
    loss1 = jax.block_until_ready(label_smoothing_loss(
        output1, target1, label_smoothing=LS1, tgt_vocab_size=V1, ignore_index=IGN1))
    ref1 = _reference(output1, target1, label_smoothing=LS1,
                      tgt_vocab_size=V1, ignore_index=IGN1)
    assert jnp.allclose(loss1, ref1, rtol=1e-4, atol=1e-4), (loss1, ref1)

    # Case 2: bf16 log-probs, negative ignore_index, ragged batch (cdiv + mask),
    # explicit vocab split to exercise the "arbitrary" V axis + VMEM accumulator.
    B2, V2 = 12, 384
    LS2, IGN2 = 0.2, -100
    logits2 = jax.random.normal(k3, (B2, V2), dtype=jnp.float32)
    output2 = jax.nn.log_softmax(logits2, axis=-1).astype(jnp.bfloat16)
    target2 = jax.random.randint(k4, (B2,), 0, V2, dtype=jnp.int32)
    target2 = target2.at[1].set(V2 + IGN2)             # target lands on the zeroed column
    loss2 = jax.block_until_ready(label_smoothing_loss(
        output2, target2, label_smoothing=LS2, tgt_vocab_size=V2,
        ignore_index=IGN2, tile_b=8, tile_v=128))
    ref2 = _reference(output2, target2, label_smoothing=LS2,
                      tgt_vocab_size=V2, ignore_index=IGN2)
    assert jnp.allclose(loss2, ref2, rtol=1e-3, atol=1e-3), (loss2, ref2)

    print("KERNEL_OK")
</pallas_src>

<mosaic_0001>
module attributes {stable_mosaic.version = 11 : i64} {
  func.func @_label_smoothing_kernel(%arg0: i32, %arg1: i32, %arg2: memref<16x1xi32, #tpu.memory_space<vmem>>, %arg3: memref<8x128xf32, #tpu.memory_space<vmem>>, %arg4: memref<1x8x128xf32, #tpu.memory_space<vmem>>, %arg5: memref<8x1xf32, #tpu.memory_space<vmem>>) attributes {dimension_semantics = [#tpu.dimension_semantics<parallel>, #tpu.dimension_semantics<arbitrary>], iteration_bounds = array<i64: 2, 1>, scalar_prefetch = 0 : i64, scratch_operands = 1 : i64, tpu.core_type = #tpu.core_type<tc>, window_params = [{pipeline_mode = #tpu.pipeline_mode<synchronous>, transform_indices = @transform_0, window_bounds = array<i64: 16, 1>}, {transform_indices = @transform_1, window_bounds = array<i64: 8, 128>}, {transform_indices = @transform_2, window_bounds = array<i64: 1, 8, 128>}]} {
    %c0 = arith.constant 0 : index
    %c0_0 = arith.constant 0 : index
    %0 = vector.load %arg3[%c0, %c0_0] : memref<8x128xf32, #tpu.memory_space<vmem>>, vector<8x128xf32>
    %1 = tpu.iota {dimensions = array<i32: 1>} : vector<8x128xi32>
    %c128_i32 = arith.constant 128 : i32
    %2 = arith.muli %arg1, %c128_i32 : i32
    %3 = vector.broadcast %2 : i32 to vector<8x128xi32>
    %4 = arith.addi %1, %3 : vector<8x128xi32>
    %c8_i32 = arith.constant 8 : i32
    %5 = arith.muli %arg0, %c8_i32 : i32
    %6 = tpu.assume_multiple %5, 8 : i32
    %7 = arith.index_cast %6 : i32 to index
    %c0_1 = arith.constant 0 : index
    %8 = vector.load %arg2[%7, %c0_1] : memref<16x1xi32, #tpu.memory_space<vmem>>, vector<8x1xi32>
    %9 = vector.broadcast %8 : vector<8x1xi32> to vector<8x128xi32>
    %10 = arith.cmpi eq, %4, %9 : vector<8x128xi32>
    %c0_i32 = arith.constant 0 : i32
    %11 = vector.broadcast %c0_i32 : i32 to vector<8x128xi32>
    %12 = arith.cmpi eq, %4, %11 : vector<8x128xi32>
    %cst = arith.constant -7.93650805E-4 : f32
    %cst_2 = arith.constant 0.000000e+00 : f32
    %13 = vector.broadcast %cst : f32 to vector<8x128xf32>
    %14 = vector.broadcast %cst_2 : f32 to vector<8x128xf32>
    %15 = arith.select %12, %13, %14 : vector<8x128xi1>, vector<8x128xf32>
    %cst_3 = arith.constant 0.89920634 : f32
    %16 = vector.broadcast %cst_3 : f32 to vector<8x128xf32>
    %17 = arith.select %10, %16, %15 : vector<8x128xi1>, vector<8x128xf32>
    %cst_4 = arith.constant dense<0.000000e+00> : vector<8xf32>
    %18 = vector.multi_reduction <add>, %0, %cst_4 [1] : vector<8x128xf32> to vector<8xf32>
    %19 = vector.shape_cast %18 : vector<8xf32> to vector<8x1xf32>
    %cst_5 = arith.constant 7.93650805E-4 : f32
    %20 = vector.broadcast %cst_5 : f32 to vector<8x1xf32>
    %21 = arith.mulf %20, %19 : vector<8x1xf32>
    %22 = arith.mulf %17, %0 : vector<8x128xf32>
    %cst_6 = arith.constant dense<0.000000e+00> : vector<8xf32>
    %23 = vector.multi_reduction <add>, %22, %cst_6 [1] : vector<8x128xf32> to vector<8xf32>
    %24 = vector.shape_cast %23 : vector<8xf32> to vector<8x1xf32>
    %25 = arith.addf %21, %24 : vector<8x1xf32>
    %c0_i32_7 = arith.constant 0 : i32
    %26 = arith.cmpi eq, %arg1, %c0_i32_7 : i32
    %27 = arith.extui %26 : i1 to i32
    %c0_i32_8 = arith.constant 0 : i32
    %28 = arith.cmpi ne, %27, %c0_i32_8 : i32
    scf.if %28 {
      %cst_15 = arith.constant 0.000000e+00 : f32
      %35 = vector.broadcast %cst_15 : f32 to vector<8x1xf32>
      %c0_16 = arith.constant 0 : index
      %c0_17 = arith.constant 0 : index
      %36 = vector.load %arg5[%c0_16, %c0_17] : memref<8x1xf32, #tpu.memory_space<vmem>>, vector<8x1xf32>
      tpu.vector_store %arg5[%c0_16, %c0_17], %35 {strides = array<i32>} : memref<8x1xf32, #tpu.memory_space<vmem>>, vector<8x1xf32>,
    } else {
    }
    %c0_9 = arith.constant 0 : index
    %c0_10 = arith.constant 0 : index
    %29 = vector.load %arg5[%c0_9, %c0_10] : memref<8x1xf32, #tpu.memory_space<vmem>>, vector<8x1xf32>
    %30 = arith.addf %29, %25 : vector<8x1xf32>
    %c0_11 = arith.constant 0 : index
    %c0_12 = arith.constant 0 : index
    %31 = vector.load %arg5[%c0_11, %c0_12] : memref<8x1xf32, #tpu.memory_space<vmem>>, vector<8x1xf32>
    tpu.vector_store %arg5[%c0_11, %c0_12], %30 {strides = array<i32>} : memref<8x1xf32, #tpu.memory_space<vmem>>, vector<8x1xf32>,
    %c0_i32_13 = arith.constant 0 : i32
    %32 = arith.cmpi eq, %arg1, %c0_i32_13 : i32
    %33 = arith.extui %32 : i1 to i32
    %c0_i32_14 = arith.constant 0 : i32
    %34 = arith.cmpi ne, %33, %c0_i32_14 : i32
    scf.if %34 {
      %c0_i32_15 = arith.constant 0 : i32
      %35 = vector.broadcast %c0_i32_15 : i32 to vector<8x1xi32>
      %36 = arith.cmpi ne, %8, %35 : vector<8x1xi32>
      %c0_i32_16 = arith.constant 0 : i32
      %37 = vector.broadcast %c0_i32_16 : i32 to vector<8x1xi32>
      %38 = arith.cmpi eq, %8, %37 : vector<8x1xi32>
      %cst_17 = arith.constant 1.270000e+02 : f32
      %cst_18 = arith.constant 1.260000e+02 : f32
      %39 = vector.broadcast %cst_17 : f32 to vector<8x1xf32>
      %40 = vector.broadcast %cst_18 : f32 to vector<8x1xf32>
      %41 = arith.select %38, %39, %40 : vector<8x1xi1>, vector<8x1xf32>
      %cst_19 = arith.constant -0.00566576747 : f32
      %42 = vector.broadcast %cst_19 : f32 to vector<8x1xf32>
      %43 = arith.mulf %41, %42 : vector<8x1xf32>
      %cst_20 = arith.constant -0.0948244631 : f32
      %44 = vector.broadcast %cst_20 : f32 to vector<8x1xf32>
      %45 = arith.addf %44, %43 : vector<8x1xf32>
      %c0_21 = arith.constant 0 : index
      %c0_22 = arith.constant 0 : index
      %46 = vector.load %arg5[%c0_21, %c0_22] : memref<8x1xf32, #tpu.memory_space<vmem>>, vector<8x1xf32>
      %47 = arith.subf %45, %46 : vector<8x1xf32>
      %cst_23 = arith.constant 0.000000e+00 : f32
      %48 = vector.broadcast %cst_23 : f32 to vector<8x1xf32>
      %49 = arith.select %36, %47, %48 : vector<8x1xi1>, vector<8x1xf32>
      %cst_24 = arith.constant 0.000000e+00 : f32
      %50 = vector.broadcast %cst_24 : f32 to vector<1x8x128xf32>
      %51 = vector.shape_cast %49 : vector<8x1xf32> to vector<1x8x1xf32>
      %cst_25 = arith.constant dense<0.000000e+00> : vector<1xf32>
      %52 = vector.multi_reduction <add>, %51, %cst_25 [1, 2] : vector<1x8x1xf32> to vector<1xf32>
      %53 = vector.shape_cast %52 : vector<1xf32> to vector<1x1x1xf32>
      %54 = vector.extract %53[0, 0, 0] : f32 from vector<1x1x1xf32>
      %55 = vector.broadcast %54 : f32 to vector<1x8x128xf32>
      %56 = arith.addf %50, %55 : vector<1x8x128xf32>
      %c0_26 = arith.constant 0 : index
      %c0_27 = arith.constant 0 : index
      %c0_28 = arith.constant 0 : index
      %57 = vector.load %arg4[%c0_26, %c0_27, %c0_28] : memref<1x8x128xf32, #tpu.memory_space<vmem>>, vector<1x8x128xf32>
      tpu.vector_store %arg4[%c0_26, %c0_27, %c0_28], %56 {strides = array<i32>} : memref<1x8x128xf32, #tpu.memory_space<vmem>>, vector<1x8x128xf32>,
    } else {
    }
    return
  }
  func.func @transform_0(%arg0: i32, %arg1: i32) -> (i32, i32) {
    %c0_i32 = arith.constant 0 : i32
    %c0_i32_0 = arith.constant 0 : i32
    %c0_i32_1 = arith.constant 0 : i32
    return %c0_i32, %c0_i32_0 : i32, i32
  }
  func.func @transform_1(%arg0: i32, %arg1: i32) -> (i32, i32) {
    %c0_i32 = arith.constant 0 : i32
    return %arg0, %arg1 : i32, i32
  }
  func.func @transform_2(%arg0: i32, %arg1: i32) -> (i32, i32, i32) {
    %c0_i32 = arith.constant 0 : i32
    %c0_i32_0 = arith.constant 0 : i32
    %c0_i32_1 = arith.constant 0 : i32
    return %arg0, %c0_i32, %c0_i32_0 : i32, i32, i32
  }
}

</mosaic_0001>

<bundles_post_ra>
// kernel: tpu_custom_call.1
= control target key start
LH: loop header
LB: loop body
LE: loop exit
PB: predicated region body
PF: predicated region fallthrough
CT: control target
= control target key end

     0   :  { %7 = vsyncpa [#allocation4], 0  ;;  %s585_s0 = inlined_call_operand.vmem [shape: s32[16,1], index: 0, kind: input, shape index: {}]   ;;  %s586_s1 = inlined_call_operand.vmem [shape: f32[16,128], index: 1, kind: input, shape index: {}]   ;;  %s587_s2 = inlined_call_operand.hbm [shape: f32[2,8,128], index: 2, kind: output, shape index: {}]  }
   0x1   :  { %9 = vsyncpa [#allocation4 + $0x1], 0  ;;  %s478_s9 = smov 0   ;;  %s480_s10 = smov 0  }
   0x2   :  { %s482_s11 = smov 0   ;;  %s484_s12 = smov 0  }
   0x3   :  { %s486_s13 = smov 0   ;;  %s488_s14 = smov 0  }
   0x4 LB: > { %s307_s15 = sadd.s32 4294967295, %s458_s14   ;;  %s308_s16 = sadd.s32 4294967294, %s458_s14   ;;  %s458_s14 = sphi %s488_s14, %s15_s14   ;;  %s454_s13 = sphi %s486_s13, %s594_s13   ;;  %s450_s12 = sphi %s484_s12, %s593_s12   ;;  %s446_s11 = sphi %s482_s11, %s592_s11   ;;  %s442_s10 = sphi %s480_s10, %s591_s10   ;;  %s438_s9 = sphi %s478_s9, %s590_s9  }
   0x5   : > { %s27_s17 = sadd.s32 1, %s454_s13  ;;  %s83_s18 = sadd.s32 1, %s446_s11 }
   0x6   : > { %p29_p0 = scmp.ge.s32.totalorder %s27_s17, 2  ;;  %p93_p1 = scmp.ne.s32.totalorder %s446_s11, %s442_s10 }
   0x7   : > { %p94_p2 = scmp.eq.s32.totalorder %s307_s15, 1  ;;  %p99_p3 = scmp.ne.s32.totalorder %s442_s10, %s438_s9 }
   0x8   : > { %s596_s17 = smov (%p29_p0, %s27_s17), 0  ;;  %p100_p5 = scmp.eq.s32.totalorder %s308_s16, 1 }
   0x9   : > { %p518_p4 = por %p94_p2, %p93_p1  ;;  %s80_s20 = ssub.s32 %s454_s13, %s596_s17 }
   0xa   : > { %p311_p6 = scmp.ge.s32.totalorder %s458_s14, 1  ;;  %p81_p7 = scmp.eq.s32.totalorder %s80_s20, 0 }
   0xb   : > { %p525_p8 = por %p100_p5, %p99_p3  ;;  %p131_p9 = scmp.lt.s32.totalorder %s458_s14, 3 }
   0xc   : > { %s531_s22 = scalar_select %p81_p7, %s446_s11, %s83_s18  }
   0xd   : > { %p132_p10 = pnand %p311_p6, %p131_p9 }
   0xe   : > { %s314_s23 = sshll.u32 (!%p132_p10), %s450_s12, 3  ;;  %p155_p11 = scmp.lt.s32.totalorder (!%p132_p10), %s450_s12, 1 }
   0xf   : > { %135 = sbr.rel (%p132_p10) target bundleno = 455 (0x1c7), region = 28  ;;  %s169_s26 = scalar_lea.vmem (!%p132_p10), %s585_s0, %s314_s23 }
  0x10   : > { %s152_s4 = sand.u32 (!%p132_p10), 1, %s442_s10   ;;  %s230_s8 = scalar_lea.hbm (!%p132_p10), %s587_s2, %s314_s23 }
  0x11   : > { %s312_s5 = sshll.u32 (!%p132_p10), %s152_s4, 3  ;;  %s234_s18 = sshll.u32 (!%p132_p10), %s230_s8, 4  ;;  %s235_s18 = int_to_ptr.hbm [resolvable:$true] %s234_s18 }
  0x12   : > { %s154_s15 = scalar_lea.vmem (!%p132_p10), [#allocation3], %s312_s5  ;;  %s220_s24 = scalar_lea.sflag (!%p132_p10), [#allocation4], %s152_s4 }
  0x13   : > { %s232_s16 = sshll.u32 (!%p132_p10), %s154_s15, 4  ;;  %s394_s25 = sshra.s32 (!%p132_p10), %s235_s18, 4  ;;  %s233_s16 = int_to_ptr.vmem [resolvable:$true] %s232_s16  ;;  %s395_s25 = int_to_ptr.hbm [resolvable:$true] %s394_s25 }
  0x14   : > { %v460_v0 = vmov 0   ;;  %v170_v1 = vld [vmem:[%s169_s26] sm:$0xff]  ;;  %s156_s27 = scalar_select %p155_p11, %s450_s12, 1  ;;  %v163_v3 = vlaneseq  ;;  %v461_v5 = vmov 0.0   ;;  %vm189_vm2 = vcmask 7168  }
  0x15   : > { %379 = vset.pattern.permute.xlu0 %v460_v0  ;;  %190 = vst.msk [vmem:[#allocation2] sm:$0xff] %vm189_vm2, %v461_v5  ;;  %vm199_vm3 = vcmp.eq.s32.totalorder %v170_v1, 0  ;;  %v462_v15 = vmov 126.0   ;;  %vm198_vm4 = vcmp.ne.s32.totalorder %v170_v1, 0  ;;  %s396_s26 = scalar_lea.hbm %s395_s25, 8  ;;  %s400_s23 = scalar_lea.hbm %s587_s2, 16 }
  0x16   : > { %172 = vperm.xlu0 %379, %v170_v1   ;;  %s313_s28 = sshll.u32 %s156_s27, 3  ;;  %v164_v4 = vand.u32 127, %v163_v3  ;;  %v200_v16 = vsel %vm199_vm3, 127.0, %v462_v15  ;;  %p397_p12 = scmp.ne.s32.totalorder %s395_s25, %s396_s26 }
  0x17   : > { %s161_s3 = scalar_lea.vmem %s586_s1, %s313_s28  ;;  %v201_v18 = vmul.f32 -0.0056657675, %v200_v16  ;;  %p401_p1 = scmp.lt.s32.totalorder %s395_s25, %s587_s2 }
  0x18   : > { %v162_v2 = vld [vmem:[%s161_s3] sm:$0xff]  ;;  %vm175_vm0 = vcmp.eq.s32.totalorder %v164_v4, 0  ;;  %p398_p13 = pnand %p397_p12, %p518_p4  ;;  %p402_p2 = scmp.lt.s32.totalorder %s400_s23, %s396_s26 }
  0x19   : > { %v176_v6 = vsel %vm175_vm0, -0.0007936508, %v461_v5  ;;  %v202_v19 = vadd.f32 -0.09482446, %v201_v18 }
  0x1a   : > { %p399_p0 = pneg %p398_p13  ;;  %p403_p3 = por %p402_p2, %p401_p1 }
  0x1c   : > { %v191_v12 = vld [vmem:[#allocation2] sm:$0xff]  ;;  %p404_p5 = pnand %p403_p3, %p399_p0 }
  0x40   : > { %178 = vadd.xlane.f32.xlu0 %v162_v2 }
  0x88   : > { %v173_v7 = vpop.permute.xlu0 %172 }
  0x89   : > { %vm174_vm1 = vcmp.eq.s32.totalorder %v164_v4, %v173_v7 }
  0x8a   : > { %v177_v8 = vsel %vm174_vm1, 0.89920634, %v176_v6 }
  0x8b   : > { %v181_v9 = vmul.f32 %v177_v8, %v162_v2 }
  0x8d   : > { %182 = vadd.xlane.f32.xlu1 %v181_v9 }
  0xb3   : > { %v179_v10 = vpop.xlane.xlu0 %178 }
  0xb4   : > { %v180_v11 = vmul.f32 0.0007936508, %v179_v10 }
 0x100   : > { %v183_v13 = vpop.xlane.xlu1 %182 }
 0x101   : > { %v184_v14 = vadd.f32 %v183_v13, %v180_v11 }
 0x103   : > { %v192_v17 = vadd.f32 %v191_v12, %v184_v14 }
 0x105   : > { %194 = vst.msk [vmem:[#allocation2] sm:$0xff] %vm189_vm2, %v192_v17 }
 0x10c   : > { %v203_v20 = vld [vmem:[#allocation2] sm:$0xff] }
 0x10d   : > { %v204_v21 = vsub.f32 %v202_v19, %v203_v20 }
 0x10f   : > { %v205_v22 = vsel %vm198_vm4, %v204_v21, 0.0 }
 0x110   : > { %v206_v23 = vsel %vm189_vm2, %v205_v22, 0.0 }
 0x111   : > { %207 = vadd.xlane.f32.xlu1 %v206_v23 }
 0x184   : > { %v208_v24 = vpop.xlane.xlu1 %207 }
 0x185   : > { %v209_v25 = vrot.slane %v208_v24, 4 }
 0x187   : > { %v210_v26 = vadd.f32 %v209_v25, %v208_v24 }
 0x189   : > { %v211_v27 = vrot.slane %v210_v26, 2 }
 0x18b   : > { %v212_v28 = vadd.f32 %v211_v27, %v210_v26 }
 0x18d   : > { %v213_v29 = vrot.slane %v212_v28, 1 }
 0x18f   : > { %v214_v30 = vadd.f32 %v213_v29, %v212_v28 }
 0x191   : > { %319 = vpush %v214_v30 }
 0x1c2   : > { %s320_s20 = spop %319 }
 0x1c3   : > { %v216_v31 = vstv %s320_s20 }
 0x1c4   : > { %218 = vst [vmem:[%s154_s15] sm:$0xff] %v216_v31 }
 0x1c5   : > { %407 = shalt.err (!%p404_p5)
}
 0x1c6   : > { %321 = dma.vmem_to_hbm [thread:$0]  (%p518_p4), %s233_s16, 128, %s235_s18, %s220_s24  }
 0x1c7 PF: > { %p327_p6 = scmp.ge.s32.totalorder %s458_s14, 2  ;;  %s246_s30 = sand.u32 1, %s438_s9  }
 0x1c8   : > { %s247_s3 = scalar_lea.sflag [#allocation4], %s246_s30 }
 0x1c9   : > { %p324_p7 = pnand %p327_p6, %p525_p8 }
 0x1cb   : > { %p325_p9 = pneg %p324_p7 }
 0x1cd   : > { %433 = dma.done.wait (%p325_p9), %s247_s3, 128  }
 0x1ce   : > { %435 = vsyncadd (%p325_p9), %s247_s3, 4294967168  ;;  %s15_s14 = sadd.s32 1, %s458_s14   ;;  %s590_s9 = smov %s442_s10 }
 0x1cf   : > { %p12_p10 = scmp.ge.s32.totalorder %s15_s14, 4   ;;  %s591_s10 = smov %s446_s11 }
 0x1d0   : > { %s592_s11 = smov %s531_s22  ;;  %s593_s12 = smov %s454_s13 }
 0x1d1   : > { %s594_s13 = smov %s596_s17  ;;  %14 = sbr.rel (!%p12_p10) target bundleno = 4 (0x4), region = 72 }
 0x1d6   :  { %253 = vsyncpa [#allocation4], 1 }
 0x1d7   :  { %255 = vsyncpa [#allocation4 + $0x1], 1 }

</bundles_post_ra>
